<compile_context>
chip_gen: v7x
topology: tpu7x:2x2x1
jax: 0.10.0
libtpu: 0.0.40
codegen_flags: <defaults>
</compile_context>

<pallas_src>
import jax
import jax.numpy as jnp
from jax.experimental import pallas as pl
from jax.experimental.pallas import tpu as pltpu

_LANES = 128
_SUBLANE_MULTIPLE = {1: 32, 2: 16, 4: 8}   # itemsize -> sublane packing
_VMEM_LIMIT_BYTES = 40 << 20               # > 4 x 6 MiB footprint, < v7x 64 MiB physical


def _hsigmoid_kernel(x_ref, o_ref):
    # relu6(x + 3) / 6.  Compute in f32 (free: kernel is HBM-bound) and use a
    # true divide so x >= 3 saturates to exactly 1.0, matching PyTorch.
    x = x_ref[...].astype(jnp.float32)
    y = jnp.clip(x + 3.0, 0.0, 6.0) / 6.0
    o_ref[...] = y.astype(o_ref.dtype)


def _hsigmoid_slab(x2d, *, target_block_bytes, donate_input):
    """Run the kernel on a lane-dense (rows, width) slab with width % 128 == 0."""
    rows, width = x2d.shape
    dtype = x2d.dtype
    itemsize = jnp.dtype(dtype).itemsize
    sub = _SUBLANE_MULTIPLE.get(itemsize, 8)

    # Largest block respecting target_block_bytes (rows a multiple of the
    # dtype's sublane packing so every non-last block is layout-aligned).
    max_tile_rows = max(sub, (target_block_bytes // (width * itemsize)) // sub * sub)

    # Megacore balance (v7x has 2 TCs sharing HBM): make sure mid/large tensors
    # produce several grid blocks so both cores get work and the pipeline ramps.
    total_bytes = rows * width * itemsize
    if total_bytes >= (8 << 20):
        min_blocks = 8
    elif total_bytes >= (2 << 20):
        min_blocks = 2
    else:
        min_blocks = 1
    balanced_rows = -(-rows // min_blocks)            # ceil
    balanced_rows = -(-balanced_rows // sub) * sub    # round up to sublane multiple

    tile_rows = min(max_tile_rows, balanced_rows)
    if tile_rows >= rows:
        tile_rows = rows   # single full-extent block (always a legal block shape)

    grid = (pl.cdiv(rows, tile_rows),)   # ragged last block is clipped by Pallas

    n = rows * width
    cost = pl.CostEstimate(
        flops=4 * n,                        # add, two clamps, divide
        transcendentals=0,
        bytes_accessed=2 * n * itemsize,    # one HBM read + one HBM write
    )

    return pl.pallas_call(
        _hsigmoid_kernel,
        out_shape=jax.ShapeDtypeStruct((rows, width), dtype),
        grid_spec=pltpu.PrefetchScalarGridSpec(
            num_scalar_prefetch=0,
            grid=grid,
            in_specs=[pl.BlockSpec((tile_rows, width), lambda i: (i, 0))],
            out_specs=pl.BlockSpec((tile_rows, width), lambda i: (i, 0)),
        ),
        compiler_params=pltpu.CompilerParams(
            dimension_semantics=("parallel",),
            vmem_limit_bytes=_VMEM_LIMIT_BYTES,
            allow_input_fusion=[True],      # let XLA fold the producer into the load
        ),
        cost_estimate=cost,
        input_output_aliases=({0: 0} if donate_input else {}),
    )(x2d)


def hsigmoid(x: jax.Array, *, target_block_bytes: int = 6 << 20,
             donate_input: bool = False) -> jax.Array:
    """Elementwise hard-sigmoid: relu6(x + 3) / 6, computed in a Pallas TPU kernel.

    Set donate_input=True only when the caller donates x (e.g. jit donate_argnums);
    it aliases the output onto the input buffer and avoids a second HBM allocation.
    """
    orig_shape = x.shape
    dtype = x.dtype
    n = int(x.size)
    if n == 0:
        return x

    flat = x.reshape(-1)
    aligned = (n // _LANES) * _LANES

    def pick_width(m):
        # Any multiple of 128 gives lane-dense, unmasked stores; block bytes set
        # the DMA size, so the exact width is not a perf lever.
        if m % 512 == 0:
            return 512
        if m % 256 == 0:
            return 256
        return _LANES

    if aligned == n:
        # Common case: pure reshape -> exactly one HBM read + one HBM write.
        width = pick_width(n)
        out2d = _hsigmoid_slab(
            flat.reshape(n // width, width),
            target_block_bytes=target_block_bytes,
            donate_input=donate_input,
        )
        return out2d.reshape(orig_shape)

    # Awkward size: kernel on the largest 128-aligned prefix (no pad/copy);
    # finish the tiny (< 128 element) tail with plain jnp.
    tail = flat[aligned:]
    tail_y = (jnp.clip(tail.astype(jnp.float32) + 3.0, 0.0, 6.0) / 6.0).astype(dtype)
    if aligned == 0:
        # Fewer than 128 elements total: a kernel launch is pure overhead.
        return tail_y.reshape(orig_shape)
    width = pick_width(aligned)
    head_y = _hsigmoid_slab(
        flat[:aligned].reshape(aligned // width, width),
        target_block_bytes=target_block_bytes,
        donate_input=donate_input,
    )
    return jnp.concatenate([head_y.reshape(-1), tail_y]).reshape(orig_shape)


if __name__ == "__main__":
    key = jax.random.PRNGKey(0)
    k1, k2, k3, k4, k5 = jax.random.split(key, 5)

    def ref(v):
        v = v.astype(jnp.float32)
        return jnp.clip(v + 3.0, 0.0, 6.0) / 6.0

    # 1) Module-shaped input: NCHW batch=2, channels=4, spatial=16x16, f32.
    x = jax.random.normal(k1, (2, 4, 16, 16), dtype=jnp.float32) * 4.0
    y = jax.block_until_ready(hsigmoid(x))
    assert y.shape == x.shape and y.dtype == x.dtype
    assert jnp.allclose(y, ref(x), atol=1e-6, rtol=1e-6)
    # Exact saturation / clamp values.
    edge = jnp.array([[-10.0, -3.0, 0.0, 3.0, 10.0]] * 8, dtype=jnp.float32)
    y_edge = jax.block_until_ready(hsigmoid(jnp.tile(edge, (1, 128 // 5 + 1))[:, :128]))
    assert float(y_edge[0, 0]) == 0.0 and float(y_edge[0, 3]) == 1.0

    # 2) Awkward flat size (exercises the aligned-prefix + jnp-tail path).
    x_odd = jax.random.normal(k2, (3, 5, 19, 7), dtype=jnp.float32) * 4.0
    y_odd = jax.block_until_ready(hsigmoid(x_odd))
    assert y_odd.shape == x_odd.shape
    assert jnp.allclose(y_odd, ref(x_odd), atol=1e-6, rtol=1e-6)

    # 3) Ragged last grid block (rows=9, tile_rows=8 -> grid=2, clipped tail).
    x_rag = jax.random.normal(k3, (36, 128), dtype=jnp.float32) * 4.0
    y_rag = jax.block_until_ready(hsigmoid(x_rag, target_block_bytes=8 * 512 * 4))
    assert jnp.allclose(y_rag, ref(x_rag), atol=1e-6, rtol=1e-6)

    # 4) bf16 end-to-end (sublane pack 16; f32 math inside the kernel).
    x_bf = (jax.random.normal(k4, (2, 4, 16, 16), dtype=jnp.float32) * 4.0).astype(jnp.bfloat16)
    y_bf = jax.block_until_ready(hsigmoid(x_bf))
    assert y_bf.shape == x_bf.shape and y_bf.dtype == jnp.bfloat16
    assert jnp.allclose(y_bf.astype(jnp.float32), ref(x_bf), atol=2e-2)

    # 5) ~2 MiB tensor: min_blocks=2 -> balanced multi-block grid for megacore.
    x_big = jax.random.normal(k5, (2, 64, 64, 64), dtype=jnp.float32) * 4.0
    y_big = jax.block_until_ready(hsigmoid(x_big))
    assert jnp.allclose(y_big, ref(x_big), atol=1e-6, rtol=1e-6)

    print("KERNEL_OK")
</pallas_src>

<mosaic_0001>
module attributes {stable_mosaic.version = 11 : i64} {
  func.func @_hsigmoid_kernel(%arg0: i32, %arg1: memref<4x512xf32, #tpu.memory_space<vmem>>, %arg2: memref<4x512xf32, #tpu.memory_space<vmem>>) attributes {dimension_semantics = [#tpu.dimension_semantics<parallel>], iteration_bounds = array<i64: 1>, scalar_prefetch = 0 : i64, scratch_operands = 0 : i64, tpu.core_type = #tpu.core_type<tc>, window_params = [{transform_indices = @transform_0, window_bounds = array<i64: 4, 512>}, {transform_indices = @transform_1, window_bounds = array<i64: 4, 512>}]} {
    %c0 = arith.constant 0 : index
    %c0_0 = arith.constant 0 : index
    %0 = vector.load %arg1[%c0, %c0_0] : memref<4x512xf32, #tpu.memory_space<vmem>>, vector<4x512xf32>
    %cst = arith.constant 3.000000e+00 : f32
    %1 = vector.broadcast %cst : f32 to vector<4x512xf32>
    %2 = arith.addf %0, %1 : vector<4x512xf32>
    %cst_1 = arith.constant 0.000000e+00 : f32
    %cst_2 = arith.constant 6.000000e+00 : f32
    %3 = vector.broadcast %cst_1 : f32 to vector<4x512xf32>
    %4 = arith.maximumf %3, %2 : vector<4x512xf32>
    %5 = vector.broadcast %cst_2 : f32 to vector<4x512xf32>
    %6 = arith.minimumf %5, %4 : vector<4x512xf32>
    %cst_3 = arith.constant 6.000000e+00 : f32
    %7 = vector.broadcast %cst_3 : f32 to vector<4x512xf32>
    %8 = arith.divf %6, %7 : vector<4x512xf32>
    %c0_4 = arith.constant 0 : index
    %c0_5 = arith.constant 0 : index
    %9 = vector.load %arg2[%c0_4, %c0_5] : memref<4x512xf32, #tpu.memory_space<vmem>>, vector<4x512xf32>
    tpu.vector_store %arg2[%c0_4, %c0_5], %8 {strides = array<i32>} : memref<4x512xf32, #tpu.memory_space<vmem>>, vector<4x512xf32>,
    return
  }
  func.func @transform_0(%arg0: i32) -> (i32, i32) {
    %c0_i32 = arith.constant 0 : i32
    %c0_i32_0 = arith.constant 0 : i32
    return %arg0, %c0_i32 : i32, i32
  }
  func.func @transform_1(%arg0: i32) -> (i32, i32) {
    %c0_i32 = arith.constant 0 : i32
    %c0_i32_0 = arith.constant 0 : i32
    return %arg0, %c0_i32 : i32, i32
  }
}

</mosaic_0001>

<bundles_post_ra>
// kernel: tpu_custom_call.1
= control target key start
LH: loop header
LB: loop body
LE: loop exit
PB: predicated region body
PF: predicated region fallthrough
CT: control target
= control target key end

     0   :  { %6 = vsyncpa [#allocation3], 0  ;;  %s135_s0 = inlined_call_operand.hbm [shape: f32[4,512], index: 0, kind: input, shape index: {}]   ;;  %s136_s1 = inlined_call_operand.hbm [shape: f32[4,512], index: 1, kind: output, shape index: {}]  }
   0x1   :  { %7 = vsyncpa [#allocation4], 0  ;;  %s99_s6 = smov [#allocation2]   ;;  %s51_s10 = scalar_lea.hbm %s135_s0, 256 }
   0x2   :  { %s14_s7 = sshll.u32 %s99_s6, 4  ;;  %p52_p0 = scmp.ne.s32.totalorder %s135_s0, %s51_s10  ;;  %s15_s7 = int_to_ptr.vmem [resolvable:$true] %s14_s7 }
   0x3   :  { %p55_p1 = scmp.lt.u32.totalorder %s51_s10, %s135_s0 }
   0x5   :  { %p57_p2 = pnand %p55_p1, %p52_p0 }
   0x7   :  { %60 = shalt.err (!%p57_p2)
}
   0x8   :  { %s61_s15 = scalar_lea.vmem %s15_s7, 256  ;;  %p66_p4 = scmp.lt.s32.totalorder %s15_s7, %s15_s7 }
   0x9   :  { %p62_p3 = scmp.ne.s32.totalorder %s15_s7, %s61_s15  ;;  %p67_p5 = scmp.lt.s32.totalorder %s61_s15, %s61_s15 }
   0xb   :  { %p68_p6 = por %p67_p5, %p66_p4 }
   0xd   :  { %p69_p7 = pnand %p68_p6, %p62_p3 }
   0xf   :  { %72 = shalt.err (!%p69_p7)
}
  0x10   :  { %17 = dma.hbm_to_vmem [thread:$0]  %s135_s0, 256, %s15_s7, [#allocation3]  }
  0x11   :  { %95 = dma.done.wait [#allocation3], 256  }
  0x12   :  { %96 = vsyncadd [#allocation3], 4294967040  ;;  %v21_v0 = vld [vmem:[#allocation2] sm:$0xff]  ;;  %v22_v1 = vld [vmem:[#allocation2 + $0x8] sm:$0xff]  ;;  %s100_s18 = smov [#allocation5]  }
  0x13   :  { %v23_v2 = vadd.f32 3.0, %v21_v0  ;;  %v24_v3 = vadd.f32 3.0, %v22_v1  ;;  %s40_s19 = sshll.u32 %s100_s18, 4  ;;  %s41_s19 = int_to_ptr.vmem [resolvable:$true] %s40_s19 }
  0x14   :  { %s73_s20 = scalar_lea.vmem %s41_s19, 256  ;;  %p78_p9 = scmp.lt.s32.totalorder %s41_s19, %s41_s19 }
  0x15   :  { %v25_v4 = vmax.f32 %v23_v2, 0.0  ;;  %v26_v5 = vmax.f32 %v24_v3, 0.0  ;;  %p74_p8 = scmp.ne.s32.totalorder %s41_s19, %s73_s20  ;;  %p79_p10 = scmp.lt.s32.totalorder %s73_s20, %s73_s20 }
  0x17   :  { %v27_v6 = vmin.f32 %v25_v4, 6.0  ;;  %v28_v7 = vmin.f32 %v26_v5, 6.0  ;;  %p80_p11 = por %p79_p10, %p78_p9 }
  0x19   :  { %v30_v8 = vmul.f32 0.16666667, %v27_v6  ;;  %v31_v9 = vmul.f32 0.16666667, %v28_v7  ;;  %p81_p12 = pnand %p80_p11, %p74_p8 }
  0x1b   :  { %32 = vst [vmem:[#allocation5] sm:$0xff] %v30_v8  ;;  %33 = vst [vmem:[#allocation5 + $0x8] sm:$0xff] %v31_v9 }
  0x1c   :  { %84 = shalt.err (!%p81_p12)
}
  0x1d   :  { %s85_s22 = scalar_lea.hbm %s136_s1, 256 }
  0x1e   :  { %p86_p13 = scmp.ne.s32.totalorder %s136_s1, %s85_s22  ;;  %p89_p0 = scmp.lt.u32.totalorder %s85_s22, %s136_s1 }
  0x20   :  { %p91_p1 = pnand %p89_p0, %p86_p13 }
  0x22   :  { %94 = shalt.err (!%p91_p1)
}
  0x23   :  { %43 = dma.vmem_to_hbm [thread:$0]  %s41_s19, 256, %s136_s1, [#allocation4]  }
  0x24   :  { %97 = dma.done.wait [#allocation4], 256  }
  0x25   :  { %98 = vsyncadd [#allocation4], 4294967040 }
  0x26   :  { %47 = vsyncpa [#allocation3], 1 }
  0x27   :  { %48 = vsyncpa [#allocation4], 1 }

</bundles_post_ra>
